<compile_context>
chip_gen: v5e
topology: v5e:2x2
jax: 0.10.0
libtpu: 0.0.40
codegen_flags: <defaults>
</compile_context>

<pallas_src>
import functools

import jax
import jax.numpy as jnp
from jax.experimental import pallas as pl
from jax.experimental.pallas import tpu as pltpu

IMAGE_HEIGHT = 28
IMAGE_WIDTH = 28
IN_FEATURES = IMAGE_HEIGHT * IMAGE_WIDTH   # 784
NUM_CLASSES = 10

OUT_PADDED = 128    # lane-dense output width (pads 10 -> 128)
NEG_BIG = -1e30     # bias sentinel for padded class lanes -> exp() underflows to 0

# 4096 rows of raw f32[784] is ~12.25 MiB per buffer; double-buffered input
# plus bf16 output and resident weights fits comfortably in a 48 MiB scoped
# VMEM budget on every generation (v7x physical VMEM is 64 MiB).
DEFAULT_BATCH_TILE = 4096
VMEM_LIMIT_BYTES = 48 * 1024 * 1024


def _round_up(x: int, m: int) -> int:
    return (x + m - 1) // m * m


def _choose_tiling(batch: int, batch_tile: int) -> tuple[int, int]:
    """Pick (tile_rows, num_tiles): even split, multiple of 8, >=2 tiles for
    B > 16 so the parallel batch axis uses both v7x TensorCores, and padding
    waste bounded to <8 rows per tile."""
    num_tiles = max(1, pl.cdiv(batch, batch_tile))
    if batch > 16:
        num_tiles = max(num_tiles, 2)
    tb = _round_up(pl.cdiv(batch, num_tiles), 8)
    num_tiles = pl.cdiv(batch, tb)
    return tb, num_tiles


def _net_kernel(x_ref, w_ref, b_ref, o_ref):
    # x_ref: [TB, 784]      raw input rows (f32 or bf16), streamed per tile
    # w_ref: [784, 128]     bf16, resident across grid steps
    # b_ref: [1, 128]       f32, padded class lanes hold NEG_BIG
    # o_ref: [TB, 128]      bf16 probabilities (padded lanes ~0)
    x_bf = x_ref[...].astype(jnp.bfloat16)          # no-op if input is bf16
    logits = jnp.dot(x_bf, w_ref[...],
                     preferred_element_type=jnp.float32) + b_ref[...]
    m = jnp.max(logits, axis=-1, keepdims=True)
    e = jnp.exp(logits - m)
    denom = jnp.sum(e, axis=-1, keepdims=True)
    # approx reciprocal runs on the otherwise-idle EUP slot; rows sum to 1
    # within ~1e-3 which is plenty for class probabilities.
    o_ref[...] = (e * pl.reciprocal(denom, approx=True)).astype(o_ref.dtype)


@functools.partial(jax.jit, static_argnames=("batch_tile",))
def net_forward(x: jax.Array, weight_t: jax.Array, bias: jax.Array,
                *, batch_tile: int = DEFAULT_BATCH_TILE) -> jax.Array:
    """Pallas equivalent of Net.forward.

    Args:
        x:        [B, 784] float32 (or bfloat16) flattened MNIST images.
        weight_t: [784, 10] float32 (transpose of PyTorch fc.weight).
        bias:     [10] float32 (fc.bias).

    Returns:
        [B, 10] float32 softmax probabilities.
    """
    B = x.shape[0]
    tb, num_tiles = _choose_tiling(B, batch_tile)

    # Tiny parameter prep (W is ~0.2 MiB, negligible HBM traffic):
    # pad classes 10 -> 128; padded class lanes get a huge negative bias so
    # softmax ignores them.
    w_p = (jnp.zeros((IN_FEATURES, OUT_PADDED), jnp.bfloat16)
           .at[:, :NUM_CLASSES].set(weight_t.astype(jnp.bfloat16)))
    b_p = (jnp.full((1, OUT_PADDED), NEG_BIG, jnp.float32)
           .at[0, :NUM_CLASSES].set(bias.astype(jnp.float32)))

    rows = num_tiles * tb
    x_itemsize = jnp.dtype(x.dtype).itemsize
    cost = pl.CostEstimate(
        flops=2 * rows * IN_FEATURES * OUT_PADDED,
        transcendentals=rows * OUT_PADDED,
        bytes_accessed=(rows * IN_FEATURES * x_itemsize        # x streamed raw
                        + IN_FEATURES * OUT_PADDED * 2         # W (bf16)
                        + rows * OUT_PADDED * 2),              # out (bf16)
    )

    out = pl.pallas_call(
        _net_kernel,
        out_shape=jax.ShapeDtypeStruct((B, OUT_PADDED), jnp.bfloat16),
        grid=(num_tiles,),
        in_specs=[
            # Stream raw x; last block may extend past B (masked / don't-care
            # rows, sliced off below).
            pl.BlockSpec((tb, IN_FEATURES), lambda i: (i, 0)),
            pl.BlockSpec((IN_FEATURES, OUT_PADDED), lambda i: (0, 0)),  # resident W
            pl.BlockSpec((1, OUT_PADDED), lambda i: (0, 0)),            # resident b
        ],
        out_specs=pl.BlockSpec((tb, OUT_PADDED), lambda i: (i, 0)),
        compiler_params=pltpu.CompilerParams(
            # batch axis is embarrassingly parallel -> shards across the two
            # TensorCores on v7x; no-op on single-TC v5e/v6e.
            dimension_semantics=("parallel",),
            vmem_limit_bytes=VMEM_LIMIT_BYTES,
        ),
        cost_estimate=cost,
    )(x, w_p, b_p)

    # Strip lane padding of the class dim; rows are already exactly B.
    # TODO(synk): if a consumer (argmax / NLL loss) follows, fuse it into the
    # kernel instead of materializing probabilities at all.
    return out[:, :NUM_CLASSES].astype(jnp.float32)


def init_params(key: jax.Array):
    """Deterministic parameter init mimicking nn.Linear's default
    (uniform in [-1/sqrt(fan_in), 1/sqrt(fan_in)])."""
    kw, kb = jax.random.split(key)
    bound = 1.0 / jnp.sqrt(jnp.float32(IN_FEATURES))
    # PyTorch stores weight as [out, in]; we keep the transposed [in, out] layout.
    weight_t = jax.random.uniform(
        kw, (IN_FEATURES, NUM_CLASSES), jnp.float32, minval=-bound, maxval=bound
    )
    bias = jax.random.uniform(
        kb, (NUM_CLASSES,), jnp.float32, minval=-bound, maxval=bound
    )
    return weight_t, bias


if __name__ == "__main__":
    key = jax.random.PRNGKey(0)
    k_params, k_x, k_x2 = jax.random.split(key, 3)

    weight_t, bias = init_params(k_params)

    # Case 1: batch that is a multiple of 8.
    batch = 8
    x = jax.random.normal(k_x, (batch, IN_FEATURES), dtype=jnp.float32)
    probs = jax.block_until_ready(net_forward(x, weight_t, bias))

    assert probs.shape == (batch, NUM_CLASSES)
    assert jnp.allclose(jnp.sum(probs, axis=1), 1.0, atol=1e-2)
    ref = jax.nn.softmax(x @ weight_t + bias, axis=1)
    assert jnp.allclose(probs, ref, atol=2e-2)

    # Case 2: batch not a multiple of 8 -> exercises the masked final block.
    batch2 = 12
    x2 = jax.random.normal(k_x2, (batch2, IN_FEATURES), dtype=jnp.float32)
    probs2 = jax.block_until_ready(net_forward(x2, weight_t, bias))

    assert probs2.shape == (batch2, NUM_CLASSES)
    assert jnp.allclose(jnp.sum(probs2, axis=1), 1.0, atol=1e-2)
    ref2 = jax.nn.softmax(x2 @ weight_t + bias, axis=1)
    assert jnp.allclose(probs2, ref2, atol=2e-2)

    print("KERNEL_OK")
</pallas_src>

<mosaic_0001>
module attributes {stable_mosaic.version = 11 : i64} {
  func.func @_net_kernel(%arg0: i32, %arg1: memref<8x784xf32, #tpu.memory_space<vmem>>, %arg2: memref<784x128xbf16, #tpu.memory_space<vmem>>, %arg3: memref<1x128xf32, #tpu.memory_space<vmem>>, %arg4: memref<8x128xbf16, #tpu.memory_space<vmem>>) attributes {dimension_semantics = [#tpu.dimension_semantics<parallel>], iteration_bounds = array<i64: 1>, scalar_prefetch = 0 : i64, scratch_operands = 0 : i64, tpu.core_type = #tpu.core_type<tc>, window_params = [{transform_indices = @transform_0, window_bounds = array<i64: 8, 784>}, {pipeline_mode = #tpu.pipeline_mode<synchronous>, transform_indices = @transform_1, window_bounds = array<i64: 784, 128>}, {pipeline_mode = #tpu.pipeline_mode<synchronous>, transform_indices = @transform_2, window_bounds = array<i64: 1, 128>}, {transform_indices = @transform_3, window_bounds = array<i64: 8, 128>}]} {
    %c0 = arith.constant 0 : index
    %c0_0 = arith.constant 0 : index
    %0 = vector.load %arg1[%c0, %c0_0] : memref<8x784xf32, #tpu.memory_space<vmem>>, vector<8x784xf32>
    %1 = arith.truncf %0 : vector<8x784xf32> to vector<8x784xbf16>
    %c0_1 = arith.constant 0 : index
    %c0_2 = arith.constant 0 : index
    %2 = vector.load %arg2[%c0_1, %c0_2] : memref<784x128xbf16, #tpu.memory_space<vmem>>, vector<784x128xbf16>
    %cst = arith.constant dense<0.000000e+00> : vector<8x128xf32>
    %3 = tpu.matmul %1, %2, %cst {dimension_numbers = #tpu.dot_dimension_numbers<[1], [0], [0], [1], [0, 0, 1, 1], [], []>} : vector<8x784xbf16>, vector<784x128xbf16>, vector<8x128xf32> -> vector<8x128xf32>
    %c0_3 = arith.constant 0 : index
    %c0_4 = arith.constant 0 : index
    %4 = vector.load %arg3[%c0_3, %c0_4] : memref<1x128xf32, #tpu.memory_space<vmem>>, vector<1x128xf32>
    %5 = vector.broadcast %4 : vector<1x128xf32> to vector<8x128xf32>
    %6 = arith.addf %3, %5 : vector<8x128xf32>
    %cst_5 = arith.constant dense<0xFF800000> : vector<8xf32>
    %7 = vector.multi_reduction <maximumf>, %6, %cst_5 [1] : vector<8x128xf32> to vector<8xf32>
    %8 = vector.shape_cast %7 : vector<8xf32> to vector<8x1xf32>
    %9 = vector.broadcast %8 : vector<8x1xf32> to vector<8x128xf32>
    %10 = arith.subf %6, %9 : vector<8x128xf32>
    %11 = math.exp %10 : vector<8x128xf32>
    %cst_6 = arith.constant dense<0.000000e+00> : vector<8xf32>
    %12 = vector.multi_reduction <add>, %11, %cst_6 [1] : vector<8x128xf32> to vector<8xf32>
    %13 = vector.shape_cast %12 : vector<8xf32> to vector<8x1xf32>
    %14 = tpu.reciprocal %13 {approx = true} : vector<8x1xf32> -> vector<8x1xf32>
    %15 = vector.broadcast %14 : vector<8x1xf32> to vector<8x128xf32>
    %16 = arith.mulf %11, %15 : vector<8x128xf32>
    %17 = arith.truncf %16 : vector<8x128xf32> to vector<8x128xbf16>
    %c0_7 = arith.constant 0 : index
    %c0_8 = arith.constant 0 : index
    %18 = vector.load %arg4[%c0_7, %c0_8] : memref<8x128xbf16, #tpu.memory_space<vmem>>, vector<8x128xbf16>
    tpu.vector_store %arg4[%c0_7, %c0_8], %17 {strides = array<i32>} : memref<8x128xbf16, #tpu.memory_space<vmem>>, vector<8x128xbf16>,
    return
  }
  func.func @transform_0(%arg0: i32) -> (i32, i32) {
    %c0_i32 = arith.constant 0 : i32
    %c0_i32_0 = arith.constant 0 : i32
    return %arg0, %c0_i32 : i32, i32
  }
  func.func @transform_1(%arg0: i32) -> (i32, i32) {
    %c0_i32 = arith.constant 0 : i32
    %c0_i32_0 = arith.constant 0 : i32
    %c0_i32_1 = arith.constant 0 : i32
    return %c0_i32, %c0_i32_0 : i32, i32
  }
  func.func @transform_2(%arg0: i32) -> (i32, i32) {
    %c0_i32 = arith.constant 0 : i32
    %c0_i32_0 = arith.constant 0 : i32
    %c0_i32_1 = arith.constant 0 : i32
    return %c0_i32, %c0_i32_0 : i32, i32
  }
  func.func @transform_3(%arg0: i32) -> (i32, i32) {
    %c0_i32 = arith.constant 0 : i32
    %c0_i32_0 = arith.constant 0 : i32
    return %arg0, %c0_i32 : i32, i32
  }
}

</mosaic_0001>

<bundles_post_ra>
// kernel: net_forward.1
= control target key start
LH: loop header
LB: loop body
LE: loop exit
PB: predicated region body
PF: predicated region fallthrough
CT: control target
= control target key end

     0   :  { %vm425_vm0 = vcmask 130048   ;;  %s980_s1 = inlined_call_operand.vmem [shape: bf16[784,128], index: 1, kind: input, shape index: {}]   ;;  %s981_s2 = inlined_call_operand.vmem [shape: f32[1,128], index: 2, kind: input, shape index: {}]   ;;  %s982_s0 = inlined_call_operand.vmem [shape: f32[8,784], index: 0, kind: input, shape index: {}]   ;;  %s983_s3 = inlined_call_operand.vmem [shape: bf16[8,128], index: 3, kind: output, shape index: {}]  }
   0x1   :  { %v739_v0 = vld [vmem:[%s980_s1 + $0x38] sm:$0xff]  ;;  %v738_v3 = vld [vmem:[%s980_s1 + $0x30] sm:$0xff]  ;;  %v737_v8 = vld [vmem:[%s980_s1 + $0x28] sm:$0xff] }
   0x2   :  { %v747_v1 = vld [vmem:[%s980_s1 + $0x78] sm:$0xff]  ;;  %429 = vmatpush.bf16.msra.mxu0 %v739_v0  ;;  %v746_v4 = vld [vmem:[%s980_s1 + $0x70] sm:$0xff]  ;;  %v745_v9 = vld [vmem:[%s980_s1 + $0x68] sm:$0xff] }
   0x3   :  { %v755_v2 = vld [vmem:[%s980_s1 + $0xb8] sm:$0xff]  ;;  %442 = vmatpush.bf16.msra.mxu1 %v747_v1  ;;  %v754_v5 = vld [vmem:[%s980_s1 + $0xb0] sm:$0xff]  ;;  %v753_v10 = vld [vmem:[%s980_s1 + $0xa8] sm:$0xff] }
   0x4   :  { %455 = vmatpush.bf16.msra.mxu2 %v755_v2  ;;  %v763_v6 = vld [vmem:[%s980_s1 + $0xf8] sm:$0xff]  ;;  %v762_v7 = vld [vmem:[%s980_s1 + $0xf0] sm:$0xff]  ;;  %v761_v11 = vld [vmem:[%s980_s1 + $0xe8] sm:$0xff] }
   0x5   :  { %468 = vmatpush.bf16.msra.mxu3 %v763_v6  ;;  %v736_v12 = vld [vmem:[%s980_s1 + $0x20] sm:$0xff]  ;;  %v735_v16 = vld [vmem:[%s980_s1 + $0x18] sm:$0xff]  ;;  %v734_v20 = vld [vmem:[%s980_s1 + $0x10] sm:$0xff] }
   0x6   :  { %430 = vmatpush.bf16.msra.mxu0 %v738_v3  ;;  %v744_v13 = vld [vmem:[%s980_s1 + $0x60] sm:$0xff]  ;;  %v743_v17 = vld [vmem:[%s980_s1 + $0x58] sm:$0xff]  ;;  %v742_v21 = vld [vmem:[%s980_s1 + $0x50] sm:$0xff] }
   0x7   :  { %443 = vmatpush.bf16.msra.mxu1 %v746_v4  ;;  %v752_v14 = vld [vmem:[%s980_s1 + $0xa0] sm:$0xff]  ;;  %v751_v18 = vld [vmem:[%s980_s1 + $0x98] sm:$0xff]  ;;  %v750_v22 = vld [vmem:[%s980_s1 + $0x90] sm:$0xff] }
   0x8   :  { %456 = vmatpush.bf16.msra.mxu2 %v754_v5  ;;  %v760_v15 = vld [vmem:[%s980_s1 + $0xe0] sm:$0xff]  ;;  %v759_v19 = vld [vmem:[%s980_s1 + $0xd8] sm:$0xff]  ;;  %v758_v23 = vld [vmem:[%s980_s1 + $0xd0] sm:$0xff] }
   0x9   :  { %469 = vmatpush.bf16.msra.mxu3 %v762_v7  ;;  %v733_v24 = vld [vmem:[%s980_s1 + $0x8] sm:$0xff]  ;;  %v732_v27 = vld [vmem:[%s980_s1] sm:$0xff]  ;;  %v771_v32 = vld [vmem:[%s980_s1 + $0x138] sm:$0xff] }
   0xa   :  { %431 = vmatpush.bf16.msra.mxu0 %v737_v8  ;;  %v741_v25 = vld [vmem:[%s980_s1 + $0x48] sm:$0xff]  ;;  %v740_v29 = vld [vmem:[%s980_s1 + $0x40] sm:$0xff]  ;;  %v779_v33 = vld [vmem:[%s980_s1 + $0x178] sm:$0xff] }
   0xb   :  { %444 = vmatpush.bf16.msra.mxu1 %v745_v9  ;;  %v749_v26 = vld [vmem:[%s980_s1 + $0x88] sm:$0xff]  ;;  %v15_v30 = vld [vmem:[%s982_s0] sm:$0xff]  ;;  %v17_v35 = vld [vmem:[%s982_s0 + $0x10] sm:$0xff] }
   0xc   :  { %457 = vmatpush.bf16.msra.mxu2 %v753_v10  ;;  %v757_v28 = vld [vmem:[%s980_s1 + $0xc8] sm:$0xff]  ;;  %v748_v34 = vld [vmem:[%s980_s1 + $0x80] sm:$0xff]  ;;  %v22_v36 = vpack.c.bf16 %v15_v30, %v15_v30  ;;  %v18_v40 = vld [vmem:[%s982_s0 + $0x18] sm:$0xff]  ;;  %v24_v43 = vpack.c.bf16 %v17_v35, %v17_v35 }
   0xd   :  { %470 = vmatpush.bf16.msra.mxu3 %v761_v11  ;;  %v16_v31 = vld [vmem:[%s982_s0 + $0x8] sm:$0xff]  ;;  %v756_v38 = vld [vmem:[%s980_s1 + $0xc0] sm:$0xff]  ;;  %v770_v41 = vld [vmem:[%s980_s1 + $0x130] sm:$0xff]  ;;  %v25_v44 = vpack.c.bf16 %v18_v40, %v18_v40 }
   0xe   :  { %432 = vmatpush.bf16.msra.mxu0 %v736_v12  ;;  %v23_v37 = vpack.c.bf16 %v16_v31, %v16_v31  ;;  %v780_v39 = vld [vmem:[%s980_s1 + $0x180] sm:$0xff]  ;;  %v778_v42 = vld [vmem:[%s980_s1 + $0x170] sm:$0xff]  ;;  %v769_v45 = vld [vmem:[%s980_s1 + $0x128] sm:$0xff] }
   0xf   :  { %445 = vmatpush.bf16.msra.mxu1 %v744_v13  ;;  %v777_v46 = vld [vmem:[%s980_s1 + $0x168] sm:$0xff]  ;;  %v768_v47 = vld [vmem:[%s980_s1 + $0x120] sm:$0xff]  ;;  %v767_v49 = vld [vmem:[%s980_s1 + $0x118] sm:$0xff] }
  0x10   :  { %458 = vmatpush.bf16.msra.mxu2 %v752_v14  ;;  %v776_v48 = vld [vmem:[%s980_s1 + $0x160] sm:$0xff]  ;;  %v775_v50 = vld [vmem:[%s980_s1 + $0x158] sm:$0xff]  ;;  %v21_v51 = vld [vmem:[%s982_s0 + $0x30] sm:$0xff] }
  0x11   :  { %471 = vmatpush.bf16.msra.mxu3 %v760_v15  ;;  %v766_v52 = vld [vmem:[%s980_s1 + $0x110] sm:$0xff]  ;;  %v28_v54 = vpack.c.bf16 %v21_v51, %v21_v51  ;;  %v765_v55 = vld [vmem:[%s980_s1 + $0x108] sm:$0xff]  ;;  %v764_v57 = vld [vmem:[%s980_s1 + $0x100] sm:$0xff] }
  0x12   :  { %433 = vmatpush.bf16.msra.mxu0 %v735_v16  ;;  %v774_v53 = vld [vmem:[%s980_s1 + $0x150] sm:$0xff]  ;;  %v773_v56 = vld [vmem:[%s980_s1 + $0x148] sm:$0xff]  ;;  %v772_v58 = vld [vmem:[%s980_s1 + $0x140] sm:$0xff] }
  0x13   :  { %446 = vmatpush.bf16.msra.mxu1 %v743_v17  ;;  %v19_v59 = vld [vmem:[%s982_s0 + $0x20] sm:$0xff]  ;;  %v20_v60 = vld [vmem:[%s982_s0 + $0x28] sm:$0xff] }
  0x14   :  { %459 = vmatpush.bf16.msra.mxu2 %v751_v18  ;;  %v26_v61 = vpack.c.bf16 %v19_v59, %v19_v59  ;;  %v27_v62 = vpack.c.bf16 %v20_v60, %v20_v60  ;;  %v781_v5 = vld [vmem:[%s981_s2] ss:$0 sm:$0xff] }
  0x15   :  { %472 = vmatpush.bf16.msra.mxu3 %v759_v19 }
  0x16   :  { %434 = vmatpush.bf16.msra.mxu0 %v734_v20 }
  0x17   :  { %447 = vmatpush.bf16.msra.mxu1 %v742_v21 }
  0x18   :  { %460 = vmatpush.bf16.msra.mxu2 %v750_v22 }
  0x19   :  { %473 = vmatpush.bf16.msra.mxu3 %v758_v23 }
  0x1a   :  { %435 = vmatpush.bf16.msra.mxu0 %v733_v24 }
  0x1b   :  { %448 = vmatpush.bf16.msra.mxu1 %v741_v25 }
  0x1c   :  { %461 = vmatpush.bf16.msra.mxu2 %v749_v26 }
  0x1d   :  { %474 = vmatpush.bf16.msra.mxu3 %v757_v28 }
  0x1e   :  { %436 = vmatpush.bf16.msra.mxu0 %v732_v27 }
  0x1f   :  { %449 = vmatpush.bf16.msra.mxu1 %v740_v29 }
  0x20   :  { %462 = vmatpush.bf16.msra.mxu2 %v748_v34 }
  0x21   :  { %437 = vmatmul.bf16.vlgmr.msra.gmra.mxu0 %v22_v36  ;;  %475 = vmatpush.bf16.msra.mxu3 %v756_v38 }
  0x22   :  { %481 = vmatpush.bf16.msrb.mxu0 %v771_v32  ;;  %450 = vmatmul.bf16.vlgmr.msra.gmra.mxu1 %v23_v37 }
  0x23   :  { %494 = vmatpush.bf16.msrb.mxu1 %v779_v33  ;;  %463 = vmatmul.bf16.vlgmr.msra.gmra.mxu2 %v24_v43 }
  0x24   :  { %514 = vmatpush.bf16.msrb.mxu2 %v780_v39  ;;  %476 = vmatmul.bf16.vlgmr.msra.gmra.mxu3 %v25_v44 }
  0x26   :  { %482 = vmatpush.bf16.msrb.mxu0 %v770_v41 }
  0x27   :  { %495 = vmatpush.bf16.msrb.mxu1 %v778_v42 }
  0x2a   :  { %483 = vmatpush.bf16.msrb.mxu0 %v769_v45 }
  0x2b   :  { %496 = vmatpush.bf16.msrb.mxu1 %v777_v46 }
  0x2e   :  { %484 = vmatpush.bf16.msrb.mxu0 %v768_v47 }
  0x2f   :  { %497 = vmatpush.bf16.msrb.mxu1 %v776_v48 }
  0x32   :  { %485 = vmatpush.bf16.msrb.mxu0 %v767_v49 }
  0x33   :  { %498 = vmatpush.bf16.msrb.mxu1 %v775_v50  ;;  %731 = vmatmul.msk.bf16.vlgmr.msrb.gmra.mxu2 %vm425_vm0, %v28_v54 }
  0x36   :  { %486 = vmatpush.bf16.msrb.mxu0 %v766_v52 }
  0x37   :  { %499 = vmatpush.bf16.msrb.mxu1 %v774_v53 }
  0x3a   :  { %487 = vmatpush.bf16.msrb.mxu0 %v765_v55 }
  0x3b   :  { %500 = vmatpush.bf16.msrb.mxu1 %v773_v56 }
  0x3e   :  { %488 = vmatpush.bf16.msrb.mxu0 %v764_v57 }
  0x3f   :  { %501 = vmatpush.bf16.msrb.mxu1 %v772_v58 }
  0x41   :  { %489 = vmatmul.bf16.vlgmr.msrb.gmra.mxu0 %v26_v61 }
  0x42   :  { %502 = vmatmul.bf16.vlgmr.msrb.gmra.mxu1 %v27_v62 }
  0x9e   :  { %v438_v63 = vpop.f32.mrf.mxu0 }
  0x9f   :  { %v451_v0 = vpop.f32.mrf.mxu1  ;;  %v439_v6 = vadd.f32 %v781_v5, %v438_v63 }
  0xa1   :  { %v452_v9 = vadd.f32 %v451_v0, %v439_v6 }
  0xa6   :  { %v440_v1 = vpop.f32.mrf.mxu0  ;;  %v464_v3 = vpop.f32.mrf.mxu2 }
  0xa7   :  { %v453_v2 = vpop.f32.mrf.mxu1  ;;  %v477_v4 = vpop.f32.mrf.mxu3  ;;  %v465_v10 = vadd.f32 %v464_v3, %v452_v9 }
  0xa9   :  { %v478_v12 = vadd.f32 %v477_v4, %v465_v10 }
  0xae   :  { %v466_v7 = vpop.f32.mrf.mxu2 }
  0xaf   :  { %v479_v8 = vpop.f32.mrf.mxu3 }
  0xb6   :  { %v516_v11 = vpop.f32.mrf.mxu2 }
  0xbe   :  { %v490_v13 = vpop.f32.mrf.mxu0  ;;  %v518_v17 = vpop.f32.mrf.mxu2 }
  0xbf   :  { %v503_v14 = vpop.f32.mrf.mxu1  ;;  %v491_v15 = vadd.f32 %v490_v13, %v478_v12 }
  0xc1   :  { %v504_v16 = vadd.f32 %v503_v14, %v491_v15 }
  0xc3   :  { %v517_v18 = vadd.f32 %v516_v11, %v504_v16 }
  0xc5   :  { %520 = vmax.xlane.f32.xlu0 %v517_v18 }
  0xc6   :  { %v492_v19 = vpop.f32.mrf.mxu0 }
  0xc7   :  { %v505_v20 = vpop.f32.mrf.mxu1 }
 0x138   :  { %v521_v21 = vpop.xlane.xlu0 %520 }
 0x139   :  { %v522_v22 = vsub.f32 %v517_v18, %v521_v21 }
 0x13b   :  { %v523_v23 = vmul.f32 1.442695, %v522_v22 }
 0x13d   :  { %782 = vpow2.f32 %v523_v23 }
 0x143   :  { %v783_v24 = vpop.eup %782 }
 0x144   :  { %525 = vadd.xlane.f32.xlu0 %v783_v24 }
 0x1b7   :  { %v526_v25 = vpop.xlane.xlu0 %525 }
 0x1b8   :  { %784 = vrcp.f32 %v526_v25 }
 0x1be   :  { %v785_v26 = vpop.eup %784 }
 0x1bf   :  { %v528_v27 = vmul.f32 %v785_v26, %v783_v24 }
 0x1c1   :  { %v529_v28 = vpack.c.bf16 %v528_v27, %v528_v27 }
 0x1c3   :  { %530 = vst [vmem:[%s983_s3] sm:$0xf] %v529_v28 }

</bundles_post_ra>
